<compile_context>
chip_gen: v5e
topology: v5e:2x2
jax: 0.10.0
libtpu: 0.0.40
codegen_flags: <defaults>
</compile_context>

<pallas_src>
import jax
import jax.numpy as jnp
from jax.experimental import pallas as pl
from jax.experimental.pallas import tpu as pltpu

HIDDEN = 128


def anet_kernel(xt_ref, w1t_ref, b1_ref, w2t_ref, b2_ref, ot_ref):
    # fc1: (hidden, s_dim) @ (s_dim, TB) -> (hidden, TB); batch on lanes, so
    # the x block is lane-dense.  K = s_dim is tiny but fc1 FLOPs are tiny too.
    h = jnp.dot(w1t_ref[...], xt_ref[...], preferred_element_type=jnp.float32)
    h = jnp.maximum(h + b1_ref[...], 0.0)            # bias bcast along lanes
    # out: (a_sub, hidden) @ (hidden, TB) -> (a_sub, TB); tanh runs over only
    # a_sub (=8) sublane rows instead of 128 padded lanes per batch row.
    o = jnp.dot(w2t_ref[...], h, preferred_element_type=jnp.float32)
    ot_ref[...] = jnp.tanh(o + b2_ref[...])


def _round_up(n, m):
    return ((n + m - 1) // m) * m


def anet_forward(x, w1, b1, w2, b2, *, tile_b=2048):
    """ANet forward: tanh(relu(x @ w1 + b1) @ w2 + b2).

    x:  (B, s_dim) float32
    w1: (s_dim, 128), b1: (1, 128)        (already W^T vs. PyTorch storage)
    w2: (128, a_dim), b2: (1, a_dim)
    Returns (B, a_dim) float32.
    """
    B, s_dim = x.shape
    hidden, a_dim = w2.shape
    assert w1.shape == (s_dim, hidden)

    # --- feature-major (batch-on-lanes) plumbing --------------------------
    a_sub = max(8, _round_up(a_dim, 8))               # 2x sublane pad for a_dim=4
    w1t = w1.T                                        # (hidden, s_dim)
    b1c = b1.reshape(hidden, 1)                       # (hidden, 1)
    w2t = jnp.pad(w2.T, ((0, a_sub - a_dim), (0, 0)))            # (a_sub, hidden)
    b2c = jnp.pad(b2.reshape(a_dim, 1), ((0, a_sub - a_dim), (0, 0)))  # (a_sub, 1)

    # --- batch tiling: batch sits on the 128-lane axis ---------------------
    b_lane = _round_up(B, 128)
    tile_b = _round_up(max(128, min(int(tile_b), b_lane)), 128)
    # v7x megacore: ensure the "parallel" batch axis has >= 2 grid steps to
    # shard across the 2 TensorCores when the batch allows it; on v5e/v6e the
    # extra step costs ~0.35us (noise).
    if b_lane // tile_b < 2 and b_lane >= 256:
        tile_b = _round_up(pl.cdiv(b_lane, 2), 128)
    b_pad = _round_up(b_lane, tile_b)

    xt = jnp.pad(x.T, ((0, 0), (0, b_pad - B)))       # (s_dim, b_pad)

    grid = (b_pad // tile_b,)

    out_t = pl.pallas_call(
        anet_kernel,
        out_shape=jax.ShapeDtypeStruct((a_sub, b_pad), jnp.float32),
        grid=grid,
        in_specs=[
            # x^T: tiled over batch (lanes), pipelined/double-buffered.
            pl.BlockSpec((s_dim, tile_b), lambda i: (0, i)),
            # weights/biases: constant index_map -> DMA'd once, VMEM-resident.
            pl.BlockSpec((hidden, s_dim), lambda i: (0, 0)),
            pl.BlockSpec((hidden, 1), lambda i: (0, 0)),
            pl.BlockSpec((a_sub, hidden), lambda i: (0, 0)),
            pl.BlockSpec((a_sub, 1), lambda i: (0, 0)),
        ],
        # out^T: (a_sub, tile_b) -- dense full-width store along the lane axis,
        # only a_sub=8 sublane rows of writeback per batch tile.
        out_specs=pl.BlockSpec((a_sub, tile_b), lambda i: (0, i)),
        compiler_params=pltpu.CompilerParams(
            dimension_semantics=("parallel",),
        ),
    )(xt, w1t, b1c, w2t, b2c)

    # Back to the caller-visible (B, a_dim) layout.
    return out_t[:a_dim, :B].T


def init_anet_params(key, s_dim, a_dim, hidden=HIDDEN):
    """Deterministic parameter init mirroring the PyTorch module:
    weights ~ N(0, 0.01); biases keep PyTorch Linear default
    U(-1/sqrt(fan_in), +1/sqrt(fan_in))."""
    k1, k2, k3, k4 = jax.random.split(key, 4)
    w1 = 0.01 * jax.random.normal(k1, (s_dim, hidden), dtype=jnp.float32)
    b1_bound = 1.0 / jnp.sqrt(jnp.float32(s_dim))
    b1 = jax.random.uniform(k2, (1, hidden), minval=-b1_bound, maxval=b1_bound,
                            dtype=jnp.float32)
    w2 = 0.01 * jax.random.normal(k3, (hidden, a_dim), dtype=jnp.float32)
    b2_bound = 1.0 / jnp.sqrt(jnp.float32(hidden))
    b2 = jax.random.uniform(k4, (1, a_dim), minval=-b2_bound, maxval=b2_bound,
                            dtype=jnp.float32)
    return w1, b1, w2, b2


def _reference(x, w1, b1, w2, b2):
    return jnp.tanh(jnp.maximum(x @ w1 + b1, 0.0) @ w2 + b2)


if __name__ == "__main__":
    key = jax.random.PRNGKey(0)
    k_params, k_x1, k_x2, k_x3 = jax.random.split(key, 4)

    # Small gym-like dims: s_dim = observation dim, a_dim = action dim.
    s_dim, a_dim = 8, 4
    w1, b1, w2, b2 = init_anet_params(k_params, s_dim, a_dim)

    # 1) toy batch (single grid step, batch padded to one 128-lane tile).
    x_small = jax.random.normal(k_x1, (8, s_dim), dtype=jnp.float32)
    out_small = jax.block_until_ready(anet_forward(x_small, w1, b1, w2, b2))
    ref_small = _reference(x_small, w1, b1, w2, b2)
    assert out_small.shape == (8, a_dim)
    assert jnp.allclose(out_small, ref_small, atol=1e-5), "mismatch (small batch)"

    # 2) non-tile-multiple batch: exercises batch padding and the >=2-step
    #    grid split (v7x megacore path) with the default tile size.
    x_mid = jax.random.normal(k_x2, (200, s_dim), dtype=jnp.float32)
    out_mid = jax.block_until_ready(anet_forward(x_mid, w1, b1, w2, b2))
    ref_mid = _reference(x_mid, w1, b1, w2, b2)
    assert out_mid.shape == (200, a_dim)
    assert jnp.allclose(out_mid, ref_mid, atol=1e-5), "mismatch (gridded batch)"

    # 3) larger batch with an explicit smaller tile: multi-step pipelined grid.
    x_big = jax.random.normal(k_x3, (1000, s_dim), dtype=jnp.float32)
    out_big = jax.block_until_ready(
        anet_forward(x_big, w1, b1, w2, b2, tile_b=256))
    ref_big = _reference(x_big, w1, b1, w2, b2)
    assert out_big.shape == (1000, a_dim)
    assert jnp.allclose(out_big, ref_big, atol=1e-5), "mismatch (multi-tile batch)"

    # TODO(synk): optional v6e/v7x throughput bump: cast x/w1/w2 to bfloat16
    # with f32 accumulation; kept f32 to preserve 1e-5 parity with the PyTorch
    # reference (kernel is per-step-overhead / HBM-bound, not MXU-bound).
    print("KERNEL_OK")
</pallas_src>

<mosaic_0001>
module attributes {stable_mosaic.version = 11 : i64} {
  func.func @anet_kernel(%arg0: i32, %arg1: memref<8x128xf32, #tpu.memory_space<vmem>>, %arg2: memref<128x8xf32, #tpu.memory_space<vmem>>, %arg3: memref<128x1xf32, #tpu.memory_space<vmem>>, %arg4: memref<8x128xf32, #tpu.memory_space<vmem>>, %arg5: memref<8x1xf32, #tpu.memory_space<vmem>>, %arg6: memref<8x128xf32, #tpu.memory_space<vmem>>) attributes {dimension_semantics = [#tpu.dimension_semantics<parallel>], iteration_bounds = array<i64: 1>, scalar_prefetch = 0 : i64, scratch_operands = 0 : i64, tpu.core_type = #tpu.core_type<tc>, window_params = [{transform_indices = @transform_0, window_bounds = array<i64: 8, 128>}, {pipeline_mode = #tpu.pipeline_mode<synchronous>, transform_indices = @transform_1, window_bounds = array<i64: 128, 8>}, {pipeline_mode = #tpu.pipeline_mode<synchronous>, transform_indices = @transform_2, window_bounds = array<i64: 128, 1>}, {pipeline_mode = #tpu.pipeline_mode<synchronous>, transform_indices = @transform_3, window_bounds = array<i64: 8, 128>}, {pipeline_mode = #tpu.pipeline_mode<synchronous>, transform_indices = @transform_4, window_bounds = array<i64: 8, 1>}, {transform_indices = @transform_5, window_bounds = array<i64: 8, 128>}]} {
    %c0 = arith.constant 0 : index
    %c0_0 = arith.constant 0 : index
    %0 = vector.load %arg2[%c0, %c0_0] : memref<128x8xf32, #tpu.memory_space<vmem>>, vector<128x8xf32>
    %c0_1 = arith.constant 0 : index
    %c0_2 = arith.constant 0 : index
    %1 = vector.load %arg1[%c0_1, %c0_2] : memref<8x128xf32, #tpu.memory_space<vmem>>, vector<8x128xf32>
    %cst = arith.constant dense<0.000000e+00> : vector<128x128xf32>
    %2 = tpu.matmul %0, %1, %cst {dimension_numbers = #tpu.dot_dimension_numbers<[1], [0], [0], [1], [0, 0, 1, 1], [], []>} : vector<128x8xf32>, vector<8x128xf32>, vector<128x128xf32> -> vector<128x128xf32>
    %c0_3 = arith.constant 0 : index
    %c0_4 = arith.constant 0 : index
    %3 = vector.load %arg3[%c0_3, %c0_4] : memref<128x1xf32, #tpu.memory_space<vmem>>, vector<128x1xf32>
    %4 = vector.broadcast %3 : vector<128x1xf32> to vector<128x128xf32>
    %5 = arith.addf %2, %4 : vector<128x128xf32>
    %cst_5 = arith.constant 0.000000e+00 : f32
    %6 = vector.broadcast %cst_5 : f32 to vector<128x128xf32>
    %7 = arith.maximumf %5, %6 : vector<128x128xf32>
    %c0_6 = arith.constant 0 : index
    %c0_7 = arith.constant 0 : index
    %8 = vector.load %arg4[%c0_6, %c0_7] : memref<8x128xf32, #tpu.memory_space<vmem>>, vector<8x128xf32>
    %cst_8 = arith.constant dense<0.000000e+00> : vector<8x128xf32>
    %9 = tpu.matmul %8, %7, %cst_8 {dimension_numbers = #tpu.dot_dimension_numbers<[1], [0], [0], [1], [0, 0, 1, 1], [], []>} : vector<8x128xf32>, vector<128x128xf32>, vector<8x128xf32> -> vector<8x128xf32>
    %c0_9 = arith.constant 0 : index
    %c0_10 = arith.constant 0 : index
    %10 = vector.load %arg5[%c0_9, %c0_10] : memref<8x1xf32, #tpu.memory_space<vmem>>, vector<8x1xf32>
    %11 = vector.broadcast %10 : vector<8x1xf32> to vector<8x128xf32>
    %12 = arith.addf %9, %11 : vector<8x128xf32>
    %13 = math.tanh %12 : vector<8x128xf32>
    %c0_11 = arith.constant 0 : index
    %c0_12 = arith.constant 0 : index
    %14 = vector.load %arg6[%c0_11, %c0_12] : memref<8x128xf32, #tpu.memory_space<vmem>>, vector<8x128xf32>
    tpu.vector_store %arg6[%c0_11, %c0_12], %13 {strides = array<i32>} : memref<8x128xf32, #tpu.memory_space<vmem>>, vector<8x128xf32>,
    return
  }
  func.func @transform_0(%arg0: i32) -> (i32, i32) {
    %c0_i32 = arith.constant 0 : i32
    %c0_i32_0 = arith.constant 0 : i32
    return %c0_i32, %arg0 : i32, i32
  }
  func.func @transform_1(%arg0: i32) -> (i32, i32) {
    %c0_i32 = arith.constant 0 : i32
    %c0_i32_0 = arith.constant 0 : i32
    %c0_i32_1 = arith.constant 0 : i32
    return %c0_i32, %c0_i32_0 : i32, i32
  }
  func.func @transform_2(%arg0: i32) -> (i32, i32) {
    %c0_i32 = arith.constant 0 : i32
    %c0_i32_0 = arith.constant 0 : i32
    %c0_i32_1 = arith.constant 0 : i32
    return %c0_i32, %c0_i32_0 : i32, i32
  }
  func.func @transform_3(%arg0: i32) -> (i32, i32) {
    %c0_i32 = arith.constant 0 : i32
    %c0_i32_0 = arith.constant 0 : i32
    %c0_i32_1 = arith.constant 0 : i32
    return %c0_i32, %c0_i32_0 : i32, i32
  }
  func.func @transform_4(%arg0: i32) -> (i32, i32) {
    %c0_i32 = arith.constant 0 : i32
    %c0_i32_0 = arith.constant 0 : i32
    %c0_i32_1 = arith.constant 0 : i32
    return %c0_i32, %c0_i32_0 : i32, i32
  }
  func.func @transform_5(%arg0: i32) -> (i32, i32) {
    %c0_i32 = arith.constant 0 : i32
    %c0_i32_0 = arith.constant 0 : i32
    return %c0_i32, %arg0 : i32, i32
  }
}

</mosaic_0001>

<bundles_post_ra>
// kernel: tpu_custom_call.1
= control target key start
LH: loop header
LB: loop body
LE: loop exit
PB: predicated region body
PF: predicated region fallthrough
CT: control target
= control target key end

     0   :  { %vm134_vm0 = vcmask 64512   ;;  %v360_v3 = vmov 0   ;;  %s522_s0 = inlined_call_operand.vmem [shape: f32[8,128], index: 0, kind: input, shape index: {}]   ;;  %s523_s1 = inlined_call_operand.vmem [shape: f32[128,8], index: 1, kind: input, shape index: {}]   ;;  %s524_s2 = inlined_call_operand.vmem [shape: f32[128,1], index: 2, kind: input, shape index: {}]   ;;  %s525_s3 = inlined_call_operand.vmem [shape: f32[8,128], index: 3, kind: input, shape index: {}]   ;;  %s526_s4 = inlined_call_operand.vmem [shape: f32[8,1], index: 4, kind: input, shape index: {}]   ;;  %s527_s5 = inlined_call_operand.hbm [shape: f32[8,128], index: 5, kind: output, shape index: {}]  }
   0x1   :  { %v37_v0 = vld [vmem:[%s522_s0] sm:$0xff]  ;;  %v53_v1 = vld [vmem:[%s524_s2 + $0x78] sm:$0xff]  ;;  %329 = vset.pattern.permute.xlu0 %v360_v3  ;;  %v27_v4 = vld [vmem:[%s523_s1 + $0x30] sm:$0xff]  ;;  %330 = vset.pattern.permute.xlu1 %v360_v3 }
   0x2   :  { %v21_v2 = vld [vmem:[%s523_s1] sm:$0xff]  ;;  %198 = vmatpush.msra.mxu0 %v37_v0  ;;  %325 = vmatpush.msra.mxu2 %v37_v0  ;;  %v51_v6 = vld [vmem:[%s524_s2 + $0x68] sm:$0xff]  ;;  %v49_v7 = vld [vmem:[%s524_s2 + $0x58] sm:$0xff] }
   0x3   :  { %v33_v5 = vld [vmem:[%s523_s1 + $0x60] sm:$0xff]  ;;  %326 = vmatpush.msra.mxu3 %v37_v0  ;;  %131 = vperm.xlu0 %329, %v53_v1   ;;  %v52_v8 = vld [vmem:[%s524_s2 + $0x70] sm:$0xff]  ;;  %v22_v9 = vld [vmem:[%s523_s1 + $0x8] sm:$0xff] }
   0x4   :  { %309 = vmatmul.msk.f32.vlgmr.msra.gmra.mxu0 %vm134_vm0, %v21_v2  ;;  %315 = vmatmul.msk.f32.vlgmr.msra.gmra.mxu2 %vm134_vm0, %v27_v4  ;;  %v28_v10 = vld [vmem:[%s523_s1 + $0x38] sm:$0xff]  ;;  %v34_v11 = vld [vmem:[%s523_s1 + $0x68] sm:$0xff] }
   0x5   :  { %321 = vmatmul.msk.f32.vlgmr.msra.gmra.mxu3 %vm134_vm0, %v33_v5  ;;  %331 = vset.pattern.permute.xlu2 %v360_v3 }
   0x6   :  { %121 = vperm.xlu1 %330, %v51_v6   ;;  %111 = vperm.xlu2 %331, %v49_v7  }
   0x7   :  { %10 = vsyncpa [#allocation3], 0  ;;  %v50_v12 = vld [vmem:[%s524_s2 + $0x60] sm:$0xff]  ;;  %v48_v13 = vld [vmem:[%s524_s2 + $0x50] sm:$0xff]  ;;  %s300_s11 = sshll.u32 %s527_s5, 4  ;;  %s301_s11 = int_to_ptr.hbm [resolvable:$true] %s300_s11 }
   0x8   :  { %v47_v14 = vld [vmem:[%s524_s2 + $0x48] sm:$0xff]  ;;  %v23_v15 = vld [vmem:[%s523_s1 + $0x10] sm:$0xff]  ;;  %v29_v16 = vld [vmem:[%s523_s1 + $0x40] sm:$0xff] }
   0x9   :  { %v35_v17 = vld [vmem:[%s523_s1 + $0x70] sm:$0xff]  ;;  %v46_v18 = vld [vmem:[%s524_s2 + $0x40] sm:$0xff]  ;;  %v45_v19 = vld [vmem:[%s524_s2 + $0x38] sm:$0xff] }
   0xa   :  { %v44_v20 = vld [vmem:[%s524_s2 + $0x30] sm:$0xff]  ;;  %v24_v21 = vld [vmem:[%s523_s1 + $0x18] sm:$0xff]  ;;  %v30_v22 = vld [vmem:[%s523_s1 + $0x48] sm:$0xff] }
   0xb   :  { %126 = vperm.xlu0 %329, %v52_v8   ;;  %v36_v23 = vld [vmem:[%s523_s1 + $0x78] sm:$0xff]  ;;  %v43_v24 = vld [vmem:[%s524_s2 + $0x28] sm:$0xff]  ;;  %v42_v25 = vld [vmem:[%s524_s2 + $0x20] sm:$0xff] }
   0xc   :  { %310 = vmatmul.msk.f32.gmra.mxu0 %vm134_vm0, %v22_v9  ;;  %316 = vmatmul.msk.f32.gmra.mxu2 %vm134_vm0, %v28_v10  ;;  %v41_v26 = vld [vmem:[%s524_s2 + $0x18] sm:$0xff]  ;;  %v25_v27 = vld [vmem:[%s523_s1 + $0x20] sm:$0xff]  ;;  %v31_v28 = vld [vmem:[%s523_s1 + $0x50] sm:$0xff] }
   0xd   :  { %322 = vmatmul.msk.f32.gmra.mxu3 %vm134_vm0, %v34_v11  ;;  %v40_v29 = vld [vmem:[%s524_s2 + $0x10] sm:$0xff]  ;;  %v39_v30 = vld [vmem:[%s524_s2 + $0x8] sm:$0xff]  ;;  %v38_v31 = vld [vmem:[%s524_s2] sm:$0xff] }
   0xe   :  { %116 = vperm.xlu1 %330, %v50_v12   ;;  %106 = vperm.xlu2 %331, %v48_v13   ;;  %v26_v32 = vld [vmem:[%s523_s1 + $0x28] sm:$0xff]  ;;  %v32_v33 = vld [vmem:[%s523_s1 + $0x58] sm:$0xff]  ;;  %v265_v34 = vld [vmem:[%s526_s4] sm:$0xff]  ;;  %s361_s4 = smov [#allocation2]  }
   0xf   :  { %s298_s8 = sshll.u32 %s361_s4, 4  ;;  %s299_s8 = int_to_ptr.vmem [resolvable:$true] %s298_s8 }
  0x13   :  { %101 = vperm.xlu0 %329, %v47_v14  }
  0x14   :  { %311 = vmatmul.msk.f32.gmra.mxu0 %vm134_vm0, %v23_v15  ;;  %317 = vmatmul.msk.f32.gmra.mxu2 %vm134_vm0, %v29_v16 }
  0x15   :  { %323 = vmatmul.msk.f32.gmra.mxu3 %vm134_vm0, %v35_v17 }
  0x16   :  { %96 = vperm.xlu1 %330, %v46_v18   ;;  %91 = vperm.xlu2 %331, %v45_v19  }
  0x1b   :  { %86 = vperm.xlu0 %329, %v44_v20  }
  0x1c   :  { %312 = vmatmul.msk.f32.gmra.mxu0 %vm134_vm0, %v24_v21  ;;  %318 = vmatmul.msk.f32.gmra.mxu2 %vm134_vm0, %v30_v22 }
  0x1d   :  { %324 = vmatmul.msk.f32.gmra.mxu3 %vm134_vm0, %v36_v23 }
  0x1e   :  { %81 = vperm.xlu1 %330, %v43_v24   ;;  %76 = vperm.xlu2 %331, %v42_v25  }
  0x23   :  { %71 = vperm.xlu0 %329, %v41_v26  }
  0x24   :  { %313 = vmatmul.msk.f32.gmra.mxu0 %vm134_vm0, %v25_v27  ;;  %319 = vmatmul.msk.f32.gmra.mxu2 %vm134_vm0, %v31_v28 }
  0x26   :  { %66 = vperm.xlu1 %330, %v40_v29   ;;  %61 = vperm.xlu2 %331, %v39_v30  }
  0x2b   :  { %56 = vperm.xlu0 %329, %v38_v31  }
  0x2c   :  { %314 = vmatmul.msk.f32.gmra.mxu0 %vm134_vm0, %v26_v32  ;;  %320 = vmatmul.msk.f32.gmra.mxu2 %vm134_vm0, %v32_v33 }
  0x2e   :  { %268 = vperm.xlu1 %330, %v265_v34  }
  0x60   :  { %v112_v43 = vpop.permute.xlu2 %111 }
  0x68   :  { %v107_v53 = vpop.permute.xlu2 %106 }
  0x70   :  { %v92_v0 = vpop.permute.xlu2 %91 }
  0x75   :  { %v132_v38 = vpop.permute.xlu0 %131 }
  0x78   :  { %v122_v42 = vpop.permute.xlu1 %121  ;;  %v77_v11 = vpop.permute.xlu2 %76 }
  0x7d   :  { %v127_v46 = vpop.permute.xlu0 %126 }
  0x80   :  { %v117_v52 = vpop.permute.xlu1 %116  ;;  %v62_v25 = vpop.permute.xlu2 %61 }
  0x81   :  { %v510_v35 = vpop.f32.mrf.mxu0 }
  0x85   :  { %v102_v56 = vpop.permute.xlu0 %101 }
  0x87   :  { %v218_v36 = vpop.f32.mrf.mxu2 }
  0x88   :  { %v236_v37 = vpop.f32.mrf.mxu3  ;;  %v97_v63 = vpop.permute.xlu1 %96 }
  0x89   :  { %v512_v39 = vpop.f32.mrf.mxu0  ;;  %v237_v58 = vadd.f32 %v236_v37, %v117_v52 }
  0x8a   :  { %v204_v30 = vadd.f32 %v512_v39, %v62_v25 }
  0x8b   :  { %v260_v62 = vmax.f32 %v237_v58, 0.0 }
  0x8c   :  { %v249_v33 = vmax.f32 %v204_v30, 0.0 }
  0x8d   :  { %v87_v1 = vpop.permute.xlu0 %86 }
  0x8e   :  { %v219_v16 = vadd.f32 %v218_v36, %v87_v1  ;;  %v264_v36 = vld [vmem:[%s525_s3] sm:$0xff] }
  0x8f   :  { %v221_v40 = vpop.f32.mrf.mxu2 }
  0x90   :  { %v239_v41 = vpop.f32.mrf.mxu3  ;;  %v82_v10 = vpop.permute.xlu1 %81  ;;  %v222_v12 = vadd.f32 %v221_v40, %v92_v0  ;;  %v254_v20 = vmax.f32 %v219_v16, 0.0 }
  0x91   :  { %v206_v47 = vpop.f32.mrf.mxu0  ;;  %v240_v54 = vadd.f32 %v239_v41, %v122_v42 }
  0x92   :  { %v255_v18 = vmax.f32 %v222_v12, 0.0 }
  0x93   :  { %v261_v60 = vmax.f32 %v240_v54, 0.0 }
  0x95   :  { %v72_v14 = vpop.permute.xlu0 %71 }
  0x97   :  { %v224_v44 = vpop.f32.mrf.mxu2 }
  0x98   :  { %v242_v45 = vpop.f32.mrf.mxu3  ;;  %v225_v8 = vadd.f32 %v224_v44, %v97_v63  ;;  %v67_v24 = vpop.permute.xlu1 %66 }
  0x99   :  { %v243_v50 = vadd.f32 %v242_v45, %v127_v46  ;;  %v209_v57 = vpop.f32.mrf.mxu0  ;;  %v207_v26 = vadd.f32 %v206_v47, %v67_v24 }
  0x9a   :  { %v256_v17 = vmax.f32 %v225_v8, 0.0  ;;  %v210_v22 = vadd.f32 %v209_v57, %v72_v14 }
  0x9b   :  { %v262_v59 = vmax.f32 %v243_v50, 0.0  ;;  %v250_v31 = vmax.f32 %v207_v26, 0.0 }
  0x9c   :  { %v251_v29 = vmax.f32 %v210_v22, 0.0 }
  0x9d   :  { %v57_v28 = vpop.permute.xlu0 %56 }
  0x9e   :  { %v201_v32 = vadd.f32 %v510_v35, %v57_v28 }
  0x9f   :  { %v227_v48 = vpop.f32.mrf.mxu2 }
  0xa0   :  { %v245_v49 = vpop.f32.mrf.mxu3  ;;  %v228_v6 = vadd.f32 %v227_v48, %v102_v56  ;;  %v248_v34 = vmax.f32 %v201_v32, 0.0  ;;  %v269_v37 = vpop.permute.xlu1 %268 }
  0xa1   :  { %v246_v51 = vadd.f32 %v245_v49, %v132_v38  ;;  %v212_v2 = vpop.f32.mrf.mxu0 }
  0xa2   :  { %v257_v13 = vmax.f32 %v228_v6, 0.0  ;;  %v213_v21 = vadd.f32 %v212_v2, %v77_v11 }
  0xa3   :  { %v263_v55 = vmax.f32 %v246_v51, 0.0 }
  0xa4   :  { %v252_v27 = vmax.f32 %v213_v21, 0.0 }
  0xa5   :  { %271 = vmatpush.msra.mxu1 %v263_v55 }
  0xa7   :  { %272 = vmatpush.msra.mxu1 %v262_v59  ;;  %v230_v61 = vpop.f32.mrf.mxu2 }
  0xa8   :  { %v231_v4 = vadd.f32 %v230_v61, %v107_v53 }
  0xa9   :  { %273 = vmatpush.msra.mxu1 %v261_v60  ;;  %v215_v15 = vpop.f32.mrf.mxu0 }
  0xaa   :  { %v258_v9 = vmax.f32 %v231_v4, 0.0  ;;  %v216_v19 = vadd.f32 %v215_v15, %v82_v10 }
  0xab   :  { %274 = vmatpush.msra.mxu1 %v260_v62 }
  0xac   :  { %v253_v23 = vmax.f32 %v216_v19, 0.0 }
  0xaf   :  { %v233_v3 = vpop.f32.mrf.mxu2 }
  0xb0   :  { %v234_v5 = vadd.f32 %v233_v3, %v112_v43 }
  0xb2   :  { %v259_v7 = vmax.f32 %v234_v5, 0.0 }
  0xb4   :  { %275 = vmatpush.msra.mxu1 %v259_v7 }
  0xb6   :  { %276 = vmatpush.msra.mxu1 %v258_v9 }
  0xb8   :  { %277 = vmatpush.msra.mxu1 %v257_v13 }
  0xba   :  { %278 = vmatpush.msra.mxu1 %v256_v17 }
  0xbc   :  { %279 = vmatpush.msra.mxu1 %v255_v18 }
  0xbe   :  { %280 = vmatpush.msra.mxu1 %v254_v20 }
  0xc0   :  { %281 = vmatpush.msra.mxu1 %v253_v23 }
  0xc2   :  { %282 = vmatpush.msra.mxu1 %v252_v27 }
  0xc4   :  { %283 = vmatpush.msra.mxu1 %v251_v29 }
  0xc6   :  { %284 = vmatpush.msra.mxu1 %v250_v31 }
  0xc8   :  { %285 = vmatpush.msra.mxu1 %v249_v33 }
  0xca   :  { %286 = vmatpush.msra.mxu1 %v248_v34 }
  0xcb   :  { %287 = vmatmul.f32.vlgmr.msra.gmra.mxu1 %v264_v36 }
 0x148   :  { %v288_v38 = vpop.f32.mrf.mxu1 }
 0x149   :  { %v289_v40 = vadd.f32 %v288_v38, %v269_v37 }
 0x14b   :  { %332 = vtanh.f32 %v289_v40 }
 0x151   :  { %v333_v35 = vpop.eup %332 }
 0x152   :  { %292 = vst [vmem:[#allocation2] sm:$0xff] %v333_v35 }
 0x153   :  { %303 = dma.vmem_to_hbm [thread:$0]  %s299_s8, 128, %s301_s11, [#allocation3]  }
 0x154   :  { %358 = dma.done.wait [#allocation3], 128  }
 0x155   :  { %359 = vsyncadd [#allocation3], 4294967168 }
 0x156   :  { %308 = vsyncpa [#allocation3], 1 }

</bundles_post_ra>
